<compile_context>
chip_gen: v5e
topology: v5e:2x2
jax: 0.10.0
libtpu: 0.0.40
codegen_flags: <defaults>
</compile_context>

<pallas_src>
import functools

import numpy as np

import jax
import jax.numpy as jnp
from jax.experimental import pallas as pl
from jax.experimental.pallas import tpu as pltpu


def _soft_ce_kernel(logits_ref, labels_ref, sum_out_ref, cnt_out_ref,
                    sum_acc, cnt_acc, *, class_weights, tiles_per_chunk,
                    tile_rows, s_rows, t_full, hw, ignore_index, threshold,
                    needs_col_mask, any_row_oob):
    ch = pl.program_id(1)
    t = pl.program_id(2)
    global_rt = ch * tiles_per_chunk + t          # logical row-tile index

    # Reset the per-(image, chunk) accumulators at the first row tile.
    @pl.when(t == 0)
    def _():
        sum_acc[...] = jnp.zeros_like(sum_acc)
        cnt_acc[...] = jnp.zeros_like(cnt_acc)

    c = logits_ref.shape[1]
    ts, lanes = labels_ref.shape[2], labels_ref.shape[3]
    lbl = labels_ref[0, 0].astype(jnp.int32)      # (TS, L) pixels, dense

    # Pass 1: running max over the (major) class axis -- dense VPU max tree.
    m = logits_ref[0, 0].astype(jnp.float32)
    for ci in range(1, c):
        m = jnp.maximum(m, logits_ref[0, ci].astype(jnp.float32))

    # Pass 2: exp-sum + gather of the labelled logit (and its class weight).
    # TODO(synk): optional bf16 class-tile math for v6e/v7x if still
    # VALU-bound after the layout change; kept f32 for exact parity.
    den = jnp.zeros((ts, lanes), jnp.float32)
    correct = jnp.zeros((ts, lanes), jnp.float32)
    wgt = jnp.zeros((ts, lanes), jnp.float32) if class_weights is not None else None
    for ci in range(c):
        xi = logits_ref[0, ci].astype(jnp.float32)
        den = den + jnp.exp(xi - m)
        hit = lbl == ci
        correct = correct + jnp.where(hit, xi, 0.0)
        if class_weights is not None:
            wgt = wgt + jnp.where(hit, class_weights[ci], 0.0)

    loss_val = m + jnp.log(den) - correct         # -log softmax[label]
    if class_weights is not None:
        loss_val = wgt * loss_val

    # torch semantics: ignored pixels get loss 0 and are kept iff
    # 0 >= threshold; out-of-range / padded pixels are never counted.
    valid = lbl != ignore_index
    per_pixel = jnp.where(valid, loss_val, 0.0)   # (TS, L)
    keep = per_pixel >= threshold

    def accumulate(extra_mask=None):
        k = keep if extra_mask is None else (keep & extra_mask)
        sum_acc[...] += jnp.where(k, per_pixel, 0.0)
        cnt_acc[...] += k.astype(jnp.float32)

    if needs_col_mask:
        # Rare: threshold <= 0 with lane padding -- padded (ignore-labelled)
        # pixels would otherwise be counted; mask by the flat pixel index
        # (this also covers any row-OOB tile).
        row = global_rt * tile_rows + jax.lax.broadcasted_iota(
            jnp.int32, (ts, lanes), 0)
        pix = row * lanes + jax.lax.broadcasted_iota(jnp.int32, (ts, lanes), 1)
        accumulate(pix < hw)
    elif any_row_oob:
        @pl.when(global_rt < t_full)              # hot path: fully-valid tiles
        def _():
            accumulate()

        @pl.when(global_rt >= t_full)             # trailing ragged / OOB tiles
        def _():
            row = global_rt * tile_rows + jax.lax.broadcasted_iota(
                jnp.int32, (ts, lanes), 0)
            accumulate(row < s_rows)
    else:
        accumulate()

    # Final cross-lane reduce + tiny store, once per (image, chunk).
    @pl.when(t == pl.num_programs(2) - 1)
    def _():
        s = jnp.sum(sum_acc[...])
        k = jnp.sum(cnt_acc[...])
        sum_out_ref[...] = jnp.full(sum_out_ref.shape, s, dtype=jnp.float32)
        cnt_out_ref[...] = jnp.full(cnt_out_ref.shape, k, dtype=jnp.float32)


def _pick_tile_rows(s_rows, c, logit_bytes, label_bytes, *,
                    budget_bytes=20 << 20, max_rows=512):
    """Largest sublane-row tile (multiple of 8) under an explicit VMEM budget.

    Accounts for the double-buffered logits/labels blocks, the two f32 scratch
    accumulators and ~8 lane-rows of in-kernel f32 temporaries (the per-class
    streaming formulation keeps temporaries C-independent).
    """
    per_row = (2 * c * 128 * logit_bytes      # logits block, double-buffered
               + 2 * 128 * label_bytes        # labels block, double-buffered
               + 2 * 128 * 4                  # sum/cnt scratch accumulators
               + 8 * 128 * 4)                 # in-kernel f32 temporaries
    rows = int((budget_bytes // per_row) // 8 * 8)
    rows = max(8, min(rows, max_rows))
    if rows >= s_rows:
        if s_rows >= 16:
            # Split a single-tile image in two so the parallel chunk axis
            # gives v7x's second TensorCore work even at N == 1.
            return max(8, ((pl.cdiv(s_rows, 2) + 7) // 8) * 8)
        return s_rows                         # single full-extent tile
    return rows


def soft_cross_entropy_loss(cls_score, label, *, class_weight=None,
                            loss_weight=1.0, entropy_threshold=0.4,
                            ignore_index=-100, tile_rows=None,
                            num_chunks=None):
    """JAX/Pallas equivalent of Soft_CrossEntropyLoss.forward (default cfg)."""
    n, c, h, w = cls_score.shape
    hw = h * w
    lanes = 128

    # NCHW consumed directly as (N, C, HW) -> (N, C, S, 128): a free metadata
    # reshape whenever H*W % 128 == 0 (no transpose, no full-tile pad).
    logits = cls_score.reshape(n, c, hw)
    labels = label.reshape(n, 1, hw)
    if not jnp.issubdtype(labels.dtype, jnp.signedinteger):
        labels = labels.astype(jnp.int32)

    if hw % lanes != 0:
        pad = lanes - hw % lanes              # pad only to the next lane row
        logits = jnp.pad(logits, ((0, 0), (0, 0), (0, pad)))
        labels = jnp.pad(labels, ((0, 0), (0, 0), (0, pad)),
                         constant_values=ignore_index)
    s_rows = logits.shape[-1] // lanes
    logits = logits.reshape(n, c, s_rows, lanes)
    labels = labels.reshape(n, 1, s_rows, lanes)

    if tile_rows is None:
        tile_rows = _pick_tile_rows(s_rows, c, logits.dtype.itemsize,
                                    labels.dtype.itemsize)
    tile_rows = min(int(tile_rows), s_rows)
    t_tiles = pl.cdiv(s_rows, tile_rows)
    if num_chunks is None:
        num_chunks = 2 if t_tiles >= 2 else 1
    tiles_per_chunk = pl.cdiv(t_tiles, num_chunks)
    t_full = s_rows // tile_rows                    # fully-valid row tiles
    any_row_oob = num_chunks * tiles_per_chunk > t_full
    needs_col_mask = (hw % lanes != 0) and not (entropy_threshold > 0)

    if class_weight is not None:
        # TODO(synk): traced (non-static) class_weight arrays are not
        # supported; the module config supplies a static list, baked in here.
        cw = tuple(float(v) for v in np.asarray(class_weight).reshape(-1))
        assert len(cw) == c
    else:
        cw = None

    kernel = functools.partial(
        _soft_ce_kernel, class_weights=cw, tiles_per_chunk=tiles_per_chunk,
        tile_rows=tile_rows, s_rows=s_rows, t_full=t_full, hw=hw,
        ignore_index=int(ignore_index), threshold=float(entropy_threshold),
        needs_col_mask=needs_col_mask, any_row_oob=any_row_oob)

    last_rt = t_tiles - 1   # clamp so trailing chunk tiles never DMA fully OOB

    def rt_map(i, chk, t):
        return (i, 0, jnp.minimum(chk * tiles_per_chunk + t, last_rt), 0)

    p = n * hw
    cost = pl.CostEstimate(
        flops=10 * p * c, transcendentals=p * (c + 1),
        bytes_accessed=p * c * logits.dtype.itemsize + p * labels.dtype.itemsize)

    sum_out, cnt_out = pl.pallas_call(
        kernel,
        out_shape=(jax.ShapeDtypeStruct((n, num_chunks, 8, 128), jnp.float32),
                   jax.ShapeDtypeStruct((n, num_chunks, 8, 128), jnp.float32)),
        grid_spec=pltpu.PrefetchScalarGridSpec(
            num_scalar_prefetch=0,
            grid=(n, num_chunks, tiles_per_chunk),
            in_specs=[
                pl.BlockSpec((1, c, tile_rows, lanes), rt_map),
                pl.BlockSpec((1, 1, tile_rows, lanes), rt_map),
            ],
            out_specs=[
                pl.BlockSpec((1, 1, 8, 128), lambda i, chk, t: (i, chk, 0, 0)),
                pl.BlockSpec((1, 1, 8, 128), lambda i, chk, t: (i, chk, 0, 0)),
            ],
            scratch_shapes=[pltpu.VMEM((tile_rows, lanes), jnp.float32),
                            pltpu.VMEM((tile_rows, lanes), jnp.float32)],
        ),
        compiler_params=pltpu.CompilerParams(
            dimension_semantics=("parallel", "parallel", "arbitrary"),
            vmem_limit_bytes=32 * 1024 * 1024),
        cost_estimate=cost,
    )(logits, labels)

    loss_sum = jnp.sum(sum_out[:, :, 0, 0])
    keep_cnt = jnp.sum(cnt_out[:, :, 0, 0])
    # keep_cnt == 0 yields NaN, matching the PyTorch reference's 0/0.
    return loss_weight * loss_sum / keep_cnt


def _reference_loss(cls_score, label, *, class_weight=None, loss_weight=1.0,
                    entropy_threshold=0.4, ignore_index=-100):
    """Pure-JAX reference mirroring F.cross_entropy + threshold filtering."""
    n, c, h, w = cls_score.shape
    logits = jnp.transpose(cls_score, (0, 2, 3, 1)).reshape(-1, c).astype(jnp.float32)
    lbl = label.reshape(-1).astype(jnp.int32)
    lse = jax.nn.logsumexp(logits, axis=1)
    safe = jnp.where(lbl == ignore_index, 0, lbl)
    correct = jnp.take_along_axis(logits, safe[:, None], axis=1)[:, 0]
    if class_weight is None:
        wgt = jnp.ones((c,), jnp.float32)
    else:
        wgt = jnp.asarray(class_weight, jnp.float32)
    per = jnp.where(lbl == ignore_index, 0.0, wgt[safe] * (lse - correct))
    keep = per >= entropy_threshold
    return loss_weight * jnp.sum(jnp.where(keep, per, 0.0)) / jnp.sum(keep)


if __name__ == "__main__":
    key = jax.random.PRNGKey(0)
    k1, k2, k3, k4 = jax.random.split(key, 4)

    N, C, H, W = 2, 4, 16, 16
    cls_score = jax.random.normal(k1, (N, C, H, W), dtype=jnp.float32)
    label = jax.random.randint(k2, (N, H, W), 0, C, dtype=jnp.int32)
    label = label.at[0, 0, :4].set(-100)      # a few ignored pixels

    # unweighted case
    loss = soft_cross_entropy_loss(cls_score, label)
    loss = jax.block_until_ready(loss)
    ref = _reference_loss(cls_score, label)
    assert jnp.allclose(loss, ref, rtol=1e-5, atol=1e-5), (loss, ref)

    # class-weighted + loss_weight case
    cwts = [0.5, 1.0, 2.0, 1.5]
    loss_w = soft_cross_entropy_loss(cls_score, label, class_weight=cwts,
                                     loss_weight=2.0)
    loss_w = jax.block_until_ready(loss_w)
    ref_w = _reference_loss(cls_score, label, class_weight=cwts,
                            loss_weight=2.0)
    assert jnp.allclose(loss_w, ref_w, rtol=1e-5, atol=1e-5), (loss_w, ref_w)

    # ragged spatial size (H*W % 128 != 0) exercises the lane-pad path
    H2, W2 = 10, 10
    cls2 = jax.random.normal(k3, (1, C, H2, W2), dtype=jnp.float32)
    lbl2 = jax.random.randint(k4, (1, H2, W2), 0, C, dtype=jnp.int32)
    loss2 = jax.block_until_ready(soft_cross_entropy_loss(cls2, lbl2))
    ref2 = _reference_loss(cls2, lbl2)
    assert jnp.allclose(loss2, ref2, rtol=1e-5, atol=1e-5), (loss2, ref2)

    print("KERNEL_OK")
</pallas_src>

<mosaic_0001>
module attributes {stable_mosaic.version = 11 : i64} {
  func.func @_soft_ce_kernel(%arg0: i32, %arg1: i32, %arg2: i32, %arg3: memref<1x4x2x128xf32, #tpu.memory_space<vmem>>, %arg4: memref<1x1x2x128xi32, #tpu.memory_space<vmem>>, %arg5: memref<1x1x8x128xf32, #tpu.memory_space<vmem>>, %arg6: memref<1x1x8x128xf32, #tpu.memory_space<vmem>>, %arg7: memref<2x128xf32, #tpu.memory_space<vmem>>, %arg8: memref<2x128xf32, #tpu.memory_space<vmem>>) attributes {dimension_semantics = [#tpu.dimension_semantics<parallel>, #tpu.dimension_semantics<parallel>, #tpu.dimension_semantics<arbitrary>], iteration_bounds = array<i64: 2, 1, 1>, scalar_prefetch = 0 : i64, scratch_operands = 2 : i64, tpu.core_type = #tpu.core_type<tc>, window_params = [{transform_indices = @transform_0, window_bounds = array<i64: 1, 4, 2, 128>}, {transform_indices = @transform_1, window_bounds = array<i64: 1, 1, 2, 128>}, {transform_indices = @transform_2, window_bounds = array<i64: 1, 1, 8, 128>}, {transform_indices = @transform_3, window_bounds = array<i64: 1, 1, 8, 128>}]} {
    %c0_i32 = arith.constant 0 : i32
    %0 = arith.cmpi eq, %arg2, %c0_i32 : i32
    %1 = arith.extui %0 : i1 to i32
    %c0_i32_0 = arith.constant 0 : i32
    %2 = arith.cmpi ne, %1, %c0_i32_0 : i32
    scf.if %2 {
      %cst_52 = arith.constant 0.000000e+00 : f32
      %80 = vector.broadcast %cst_52 : f32 to vector<2x128xf32>
      %c0_53 = arith.constant 0 : index
      %c0_54 = arith.constant 0 : index
      %81 = vector.load %arg7[%c0_53, %c0_54] : memref<2x128xf32, #tpu.memory_space<vmem>>, vector<2x128xf32>
      tpu.vector_store %arg7[%c0_53, %c0_54], %80 {strides = array<i32>} : memref<2x128xf32, #tpu.memory_space<vmem>>, vector<2x128xf32>,
      %cst_55 = arith.constant 0.000000e+00 : f32
      %82 = vector.broadcast %cst_55 : f32 to vector<2x128xf32>
      %c0_56 = arith.constant 0 : index
      %c0_57 = arith.constant 0 : index
      %83 = vector.load %arg8[%c0_56, %c0_57] : memref<2x128xf32, #tpu.memory_space<vmem>>, vector<2x128xf32>
      tpu.vector_store %arg8[%c0_56, %c0_57], %82 {strides = array<i32>} : memref<2x128xf32, #tpu.memory_space<vmem>>, vector<2x128xf32>,
    } else {
    }
    %c0 = arith.constant 0 : index
    %c0_1 = arith.constant 0 : index
    %c0_2 = arith.constant 0 : index
    %c0_3 = arith.constant 0 : index
    %3 = vector.load %arg4[%c0, %c0_1, %c0_2, %c0_3] : memref<1x1x2x128xi32, #tpu.memory_space<vmem>>, vector<1x1x2x128xi32>
    %4 = vector.shape_cast %3 : vector<1x1x2x128xi32> to vector<2x128xi32>
    %c0_4 = arith.constant 0 : index
    %c0_5 = arith.constant 0 : index
    %c0_6 = arith.constant 0 : index
    %c0_7 = arith.constant 0 : index
    %5 = vector.load %arg3[%c0_4, %c0_5, %c0_6, %c0_7] : memref<1x4x2x128xf32, #tpu.memory_space<vmem>>, vector<1x1x2x128xf32>
    %6 = vector.shape_cast %5 : vector<1x1x2x128xf32> to vector<2x128xf32>
    %c0_8 = arith.constant 0 : index
    %c1 = arith.constant 1 : index
    %c0_9 = arith.constant 0 : index
    %c0_10 = arith.constant 0 : index
    %7 = vector.load %arg3[%c0_8, %c1, %c0_9, %c0_10] : memref<1x4x2x128xf32, #tpu.memory_space<vmem>>, vector<1x1x2x128xf32>
    %8 = vector.shape_cast %7 : vector<1x1x2x128xf32> to vector<2x128xf32>
    %9 = arith.maximumf %6, %8 : vector<2x128xf32>
    %c0_11 = arith.constant 0 : index
    %c2 = arith.constant 2 : index
    %c0_12 = arith.constant 0 : index
    %c0_13 = arith.constant 0 : index
    %10 = vector.load %arg3[%c0_11, %c2, %c0_12, %c0_13] : memref<1x4x2x128xf32, #tpu.memory_space<vmem>>, vector<1x1x2x128xf32>
    %11 = vector.shape_cast %10 : vector<1x1x2x128xf32> to vector<2x128xf32>
    %12 = arith.maximumf %9, %11 : vector<2x128xf32>
    %c0_14 = arith.constant 0 : index
    %c3 = arith.constant 3 : index
    %c0_15 = arith.constant 0 : index
    %c0_16 = arith.constant 0 : index
    %13 = vector.load %arg3[%c0_14, %c3, %c0_15, %c0_16] : memref<1x4x2x128xf32, #tpu.memory_space<vmem>>, vector<1x1x2x128xf32>
    %14 = vector.shape_cast %13 : vector<1x1x2x128xf32> to vector<2x128xf32>
    %15 = arith.maximumf %12, %14 : vector<2x128xf32>
    %cst = arith.constant 0.000000e+00 : f32
    %16 = vector.broadcast %cst : f32 to vector<2x128xf32>
    %cst_17 = arith.constant 0.000000e+00 : f32
    %17 = vector.broadcast %cst_17 : f32 to vector<2x128xf32>
    %c0_18 = arith.constant 0 : index
    %c0_19 = arith.constant 0 : index
    %c0_20 = arith.constant 0 : index
    %c0_21 = arith.constant 0 : index
    %18 = vector.load %arg3[%c0_18, %c0_19, %c0_20, %c0_21] : memref<1x4x2x128xf32, #tpu.memory_space<vmem>>, vector<1x1x2x128xf32>
    %19 = vector.shape_cast %18 : vector<1x1x2x128xf32> to vector<2x128xf32>
    %20 = arith.subf %19, %15 : vector<2x128xf32>
    %21 = math.exp %20 : vector<2x128xf32>
    %22 = arith.addf %16, %21 : vector<2x128xf32>
    %c0_i32_22 = arith.constant 0 : i32
    %23 = vector.broadcast %c0_i32_22 : i32 to vector<2x128xi32>
    %24 = arith.cmpi eq, %4, %23 : vector<2x128xi32>
    %cst_23 = arith.constant 0.000000e+00 : f32
    %25 = vector.broadcast %cst_23 : f32 to vector<2x128xf32>
    %26 = arith.select %24, %19, %25 : vector<2x128xi1>, vector<2x128xf32>
    %27 = arith.addf %17, %26 : vector<2x128xf32>
    %c0_24 = arith.constant 0 : index
    %c1_25 = arith.constant 1 : index
    %c0_26 = arith.constant 0 : index
    %c0_27 = arith.constant 0 : index
    %28 = vector.load %arg3[%c0_24, %c1_25, %c0_26, %c0_27] : memref<1x4x2x128xf32, #tpu.memory_space<vmem>>, vector<1x1x2x128xf32>
    %29 = vector.shape_cast %28 : vector<1x1x2x128xf32> to vector<2x128xf32>
    %30 = arith.subf %29, %15 : vector<2x128xf32>
    %31 = math.exp %30 : vector<2x128xf32>
    %32 = arith.addf %22, %31 : vector<2x128xf32>
    %c1_i32 = arith.constant 1 : i32
    %33 = vector.broadcast %c1_i32 : i32 to vector<2x128xi32>
    %34 = arith.cmpi eq, %4, %33 : vector<2x128xi32>
    %cst_28 = arith.constant 0.000000e+00 : f32
    %35 = vector.broadcast %cst_28 : f32 to vector<2x128xf32>
    %36 = arith.select %34, %29, %35 : vector<2x128xi1>, vector<2x128xf32>
    %37 = arith.addf %27, %36 : vector<2x128xf32>
    %c0_29 = arith.constant 0 : index
    %c2_30 = arith.constant 2 : index
    %c0_31 = arith.constant 0 : index
    %c0_32 = arith.constant 0 : index
    %38 = vector.load %arg3[%c0_29, %c2_30, %c0_31, %c0_32] : memref<1x4x2x128xf32, #tpu.memory_space<vmem>>, vector<1x1x2x128xf32>
    %39 = vector.shape_cast %38 : vector<1x1x2x128xf32> to vector<2x128xf32>
    %40 = arith.subf %39, %15 : vector<2x128xf32>
    %41 = math.exp %40 : vector<2x128xf32>
    %42 = arith.addf %32, %41 : vector<2x128xf32>
    %c2_i32 = arith.constant 2 : i32
    %43 = vector.broadcast %c2_i32 : i32 to vector<2x128xi32>
    %44 = arith.cmpi eq, %4, %43 : vector<2x128xi32>
    %cst_33 = arith.constant 0.000000e+00 : f32
    %45 = vector.broadcast %cst_33 : f32 to vector<2x128xf32>
    %46 = arith.select %44, %39, %45 : vector<2x128xi1>, vector<2x128xf32>
    %47 = arith.addf %37, %46 : vector<2x128xf32>
    %c0_34 = arith.constant 0 : index
    %c3_35 = arith.constant 3 : index
    %c0_36 = arith.constant 0 : index
    %c0_37 = arith.constant 0 : index
    %48 = vector.load %arg3[%c0_34, %c3_35, %c0_36, %c0_37] : memref<1x4x2x128xf32, #tpu.memory_space<vmem>>, vector<1x1x2x128xf32>
    %49 = vector.shape_cast %48 : vector<1x1x2x128xf32> to vector<2x128xf32>
    %50 = arith.subf %49, %15 : vector<2x128xf32>
    %51 = math.exp %50 : vector<2x128xf32>
    %52 = arith.addf %42, %51 : vector<2x128xf32>
    %c3_i32 = arith.constant 3 : i32
    %53 = vector.broadcast %c3_i32 : i32 to vector<2x128xi32>
    %54 = arith.cmpi eq, %4, %53 : vector<2x128xi32>
    %cst_38 = arith.constant 0.000000e+00 : f32
    %55 = vector.broadcast %cst_38 : f32 to vector<2x128xf32>
    %56 = arith.select %54, %49, %55 : vector<2x128xi1>, vector<2x128xf32>
    %57 = arith.addf %47, %56 : vector<2x128xf32>
    %58 = math.log %52 : vector<2x128xf32>
    %59 = arith.addf %15, %58 : vector<2x128xf32>
    %60 = arith.subf %59, %57 : vector<2x128xf32>
    %c-100_i32 = arith.constant -100 : i32
    %61 = vector.broadcast %c-100_i32 : i32 to vector<2x128xi32>
    %62 = arith.cmpi ne, %4, %61 : vector<2x128xi32>
    %cst_39 = arith.constant 0.000000e+00 : f32
    %63 = vector.broadcast %cst_39 : f32 to vector<2x128xf32>
    %64 = arith.select %62, %60, %63 : vector<2x128xi1>, vector<2x128xf32>
    %cst_40 = arith.constant 4.000000e-01 : f32
    %65 = vector.broadcast %cst_40 : f32 to vector<2x128xf32>
    %66 = arith.cmpf oge, %64, %65 : vector<2x128xf32>
    %c0_41 = arith.constant 0 : index
    %c0_42 = arith.constant 0 : index
    %67 = vector.load %arg7[%c0_41, %c0_42] : memref<2x128xf32, #tpu.memory_space<vmem>>, vector<2x128xf32>
    %cst_43 = arith.constant 0.000000e+00 : f32
    %68 = vector.broadcast %cst_43 : f32 to vector<2x128xf32>
    %69 = arith.select %66, %64, %68 : vector<2x128xi1>, vector<2x128xf32>
    %70 = arith.addf %67, %69 : vector<2x128xf32>
    %c0_44 = arith.constant 0 : index
    %c0_45 = arith.constant 0 : index
    %71 = vector.load %arg7[%c0_44, %c0_45] : memref<2x128xf32, #tpu.memory_space<vmem>>, vector<2x128xf32>
    tpu.vector_store %arg7[%c0_44, %c0_45], %70 {strides = array<i32>} : memref<2x128xf32, #tpu.memory_space<vmem>>, vector<2x128xf32>,
    %c0_46 = arith.constant 0 : index
    %c0_47 = arith.constant 0 : index
    %72 = vector.load %arg8[%c0_46, %c0_47] : memref<2x128xf32, #tpu.memory_space<vmem>>, vector<2x128xf32>
    %73 = arith.extui %66 : vector<2x128xi1> to vector<2x128xi32>
    %74 = arith.sitofp %73 : vector<2x128xi32> to vector<2x128xf32>
    %75 = arith.addf %72, %74 : vector<2x128xf32>
    %c0_48 = arith.constant 0 : index
    %c0_49 = arith.constant 0 : index
    %76 = vector.load %arg8[%c0_48, %c0_49] : memref<2x128xf32, #tpu.memory_space<vmem>>, vector<2x128xf32>
    tpu.vector_store %arg8[%c0_48, %c0_49], %75 {strides = array<i32>} : memref<2x128xf32, #tpu.memory_space<vmem>>, vector<2x128xf32>,
    %c0_i32_50 = arith.constant 0 : i32
    %77 = arith.cmpi eq, %arg2, %c0_i32_50 : i32
    %78 = arith.extui %77 : i1 to i32
    %c0_i32_51 = arith.constant 0 : i32
    %79 = arith.cmpi ne, %78, %c0_i32_51 : i32
    scf.if %79 {
      %c0_52 = arith.constant 0 : index
      %c0_53 = arith.constant 0 : index
      %80 = vector.load %arg7[%c0_52, %c0_53] : memref<2x128xf32, #tpu.memory_space<vmem>>, vector<2x128xf32>
      %81 = vector.shape_cast %80 : vector<2x128xf32> to vector<1x2x128xf32>
      %cst_54 = arith.constant dense<0.000000e+00> : vector<1xf32>
      %82 = vector.multi_reduction <add>, %81, %cst_54 [1, 2] : vector<1x2x128xf32> to vector<1xf32>
      %83 = vector.shape_cast %82 : vector<1xf32> to vector<1x1x1xf32>
      %84 = vector.extract %83[0, 0, 0] : f32 from vector<1x1x1xf32>
      %c0_55 = arith.constant 0 : index
      %c0_56 = arith.constant 0 : index
      %85 = vector.load %arg8[%c0_55, %c0_56] : memref<2x128xf32, #tpu.memory_space<vmem>>, vector<2x128xf32>
      %86 = vector.shape_cast %85 : vector<2x128xf32> to vector<1x2x128xf32>
      %cst_57 = arith.constant dense<0.000000e+00> : vector<1xf32>
      %87 = vector.multi_reduction <add>, %86, %cst_57 [1, 2] : vector<1x2x128xf32> to vector<1xf32>
      %88 = vector.shape_cast %87 : vector<1xf32> to vector<1x1x1xf32>
      %89 = vector.extract %88[0, 0, 0] : f32 from vector<1x1x1xf32>
      %90 = vector.broadcast %84 : f32 to vector<1x1x8x128xf32>
      %c0_58 = arith.constant 0 : index
      %c0_59 = arith.constant 0 : index
      %c0_60 = arith.constant 0 : index
      %c0_61 = arith.constant 0 : index
      %91 = vector.load %arg5[%c0_58, %c0_59, %c0_60, %c0_61] : memref<1x1x8x128xf32, #tpu.memory_space<vmem>>, vector<1x1x8x128xf32>
      tpu.vector_store %arg5[%c0_58, %c0_59, %c0_60, %c0_61], %90 {strides = array<i32>} : memref<1x1x8x128xf32, #tpu.memory_space<vmem>>, vector<1x1x8x128xf32>,
      %92 = vector.broadcast %89 : f32 to vector<1x1x8x128xf32>
      %c0_62 = arith.constant 0 : index
      %c0_63 = arith.constant 0 : index
      %c0_64 = arith.constant 0 : index
      %c0_65 = arith.constant 0 : index
      %93 = vector.load %arg6[%c0_62, %c0_63, %c0_64, %c0_65] : memref<1x1x8x128xf32, #tpu.memory_space<vmem>>, vector<1x1x8x128xf32>
      tpu.vector_store %arg6[%c0_62, %c0_63, %c0_64, %c0_65], %92 {strides = array<i32>} : memref<1x1x8x128xf32, #tpu.memory_space<vmem>>, vector<1x1x8x128xf32>,
    } else {
    }
    return
  }
  func.func @transform_0(%arg0: i32, %arg1: i32, %arg2: i32) -> (i32, i32, i32, i32) {
    %c1_i32 = arith.constant 1 : i32
    %0 = arith.muli %arg1, %c1_i32 : i32
    %1 = arith.addi %0, %arg2 : i32
    %c0_i32 = arith.constant 0 : i32
    %2 = arith.minsi %1, %c0_i32 : i32
    %c0_i32_0 = arith.constant 0 : i32
    %c0_i32_1 = arith.constant 0 : i32
    %c0_i32_2 = arith.constant 0 : i32
    return %arg0, %c0_i32_0, %2, %c0_i32_1 : i32, i32, i32, i32
  }
  func.func @transform_1(%arg0: i32, %arg1: i32, %arg2: i32) -> (i32, i32, i32, i32) {
    %c1_i32 = arith.constant 1 : i32
    %0 = arith.muli %arg1, %c1_i32 : i32
    %1 = arith.addi %0, %arg2 : i32
    %c0_i32 = arith.constant 0 : i32
    %2 = arith.minsi %1, %c0_i32 : i32
    %c0_i32_0 = arith.constant 0 : i32
    %c0_i32_1 = arith.constant 0 : i32
    %c0_i32_2 = arith.constant 0 : i32
    return %arg0, %c0_i32_0, %2, %c0_i32_1 : i32, i32, i32, i32
  }
  func.func @transform_2(%arg0: i32, %arg1: i32, %arg2: i32) -> (i32, i32, i32, i32) {
    %c0_i32 = arith.constant 0 : i32
    %c0_i32_0 = arith.constant 0 : i32
    %c0_i32_1 = arith.constant 0 : i32
    return %arg0, %arg1, %c0_i32, %c0_i32_0 : i32, i32, i32, i32
  }
  func.func @transform_3(%arg0: i32, %arg1: i32, %arg2: i32) -> (i32, i32, i32, i32) {
    %c0_i32 = arith.constant 0 : i32
    %c0_i32_0 = arith.constant 0 : i32
    %c0_i32_1 = arith.constant 0 : i32
    return %arg0, %arg1, %c0_i32, %c0_i32_0 : i32, i32, i32, i32
  }
}

</mosaic_0001>

<bundles_post_ra>
// kernel: tpu_custom_call.1
= control target key start
LH: loop header
LB: loop body
LE: loop exit
PB: predicated region body
PF: predicated region fallthrough
CT: control target
= control target key end

     0   :  { %9 = vsyncpa [#allocation5], 0  ;;  %s1038_s0 = inlined_call_operand.hbm [shape: f32[2,4,2,128], index: 0, kind: input, shape index: {}]   ;;  %s1039_s1 = inlined_call_operand.hbm [shape: s32[2,1,2,128], index: 1, kind: input, shape index: {}]   ;;  %s1040_s2 = inlined_call_operand.hbm [shape: f32[2,1,8,128], index: 2, kind: output, shape index: {0}]   ;;  %s1041_s3 = inlined_call_operand.hbm [shape: f32[2,1,8,128], index: 3, kind: output, shape index: {1}]  }
   0x1   :  { %11 = vsyncpa [#allocation5 + $0x1], 0 }
   0x2   :  { %12 = vsyncpa [#allocation8], 0 }
   0x3   :  { %14 = vsyncpa [#allocation8 + $0x1], 0 }
   0x4   :  { %15 = vsyncpa [#allocation6], 0 }
   0x5   :  { %17 = vsyncpa [#allocation6 + $0x1], 0 }
   0x6   :  { %18 = vsyncpa [#allocation11], 0 }
   0x7   :  { %20 = vsyncpa [#allocation11 + $0x1], 0  ;;  %s881_s12 = smov 0   ;;  %s883_s13 = smov 0  }
   0x8   :  { %s885_s14 = smov 0   ;;  %s887_s15 = smov 0  }
   0x9   :  { %s889_s16 = smov 0   ;;  %s891_s17 = smov 0  }
   0xa LB: > { %s564_s18 = sadd.s32 4294967295, %s856_s17   ;;  %s565_s19 = sadd.s32 4294967294, %s856_s17   ;;  %s856_s17 = sphi %s891_s17, %s26_s17   ;;  %s852_s16 = sphi %s889_s16, %s1051_s16   ;;  %s848_s15 = sphi %s887_s15, %s1050_s15   ;;  %s844_s14 = sphi %s885_s14, %s1049_s14   ;;  %s840_s13 = sphi %s883_s13, %s1048_s13   ;;  %s836_s12 = sphi %s881_s12, %s1047_s12  }
   0xb   : > { %s45_s20 = sadd.s32 1, %s852_s16  ;;  %s60_s21 = sadd.s32 1, %s844_s14 }
   0xc   : > { %p47_p0 = scmp.ge.s32.totalorder %s45_s20, 2  ;;  %p67_p1 = scmp.ne.s32.totalorder %s844_s14, %s840_s13 }
   0xd   : > { %p68_p2 = scmp.eq.s32.totalorder %s856_s17, 0  ;;  %p73_p3 = scmp.ne.s32.totalorder %s840_s13, %s836_s12 }
   0xe   : > { %s1053_s20 = smov (%p47_p0, %s45_s20), 0  ;;  %p74_p5 = scmp.eq.s32.totalorder %s564_s18, 0 }
   0xf   : > { %p922_p4 = por %p68_p2, %p67_p1  ;;  %s55_s23 = ssub.s32 %s852_s16, %s1053_s20 }
  0x10   : > { %p133_p6 = scmp.eq.s32.totalorder %s564_s18, 1  ;;  %p58_p7 = scmp.eq.s32.totalorder %s55_s23, 0 }
  0x11   : > { %p928_p8 = por %p74_p5, %p73_p3  ;;  %p139_p10 = scmp.eq.s32.totalorder %s565_s19, 1 }
  0x12   : > { %p932_p9 = por %p133_p6, %p67_p1  ;;  %p567_p12 = scmp.ge.s32.totalorder %s856_s17, 2 }
  0x13   : > { %s937_s26 = scalar_select %p58_p7, %s844_s14, %s60_s21  }
  0x14   : > { %p939_p11 = por %p139_p10, %p73_p3  ;;  %p615_p13 = scmp.lt.s32.totalorder %s856_s17, 2 }
  0x15   : > { %s187_s28 = sand.u32 1, %s844_s14   ;;  %s588_s30 = sshll.u32 %s852_s16, 3 }
  0x16   : > { %s568_s29 = sshll.u32 %s187_s28, 3  ;;  %s200_s6 = scalar_lea.hbm %s1038_s0, %s588_s30 }
  0x17   : > { %s191_s7 = scalar_lea.vmem [#allocation4], %s568_s29  ;;  %s201_s9 = sshll.u32 %s200_s6, 4  ;;  %s202_s9 = int_to_ptr.hbm [resolvable:$true] %s201_s9 }
  0x18   : > { %s203_s8 = sshll.u32 %s191_s7, 4  ;;  %p952_p0 = pnand %p615_p13, %p922_p4  ;;  %s204_s8 = int_to_ptr.vmem [resolvable:$true] %s203_s8 }
  0x19   : > { %p573_p1 = scmp.ge.s32.totalorder %s856_s17, 1  ;;  %s188_s11 = scalar_lea.sflag [#allocation5], %s187_s28 }
  0x1a   : > { %s858_s18 = smov 32   ;;  %s859_s19 = smov 2  }
  0x1b   : > { %604 = dma.hbm_to_vmem [thread:$0]  (!%p952_p0), %s202_s9, 128, %s204_s8, %s188_s11, %s858_s18, %s858_s18, %s859_s19  }
  0x1c   : > { %p234_p2 = scmp.lt.s32.totalorder %s856_s17, 3  ;;  %s571_s21 = sshll.u32 %s187_s28, 1 }
  0x1d   : > { %s572_s23 = sshll.u32 %s852_s16, 1  ;;  %s217_s4 = scalar_lea.vmem [#allocation7], %s571_s21 }
  0x1e   : > { %p235_p3 = pnand %p573_p1, %p234_p2  ;;  %s225_s22 = scalar_lea.hbm %s1039_s1, %s572_s23 }
  0x1f   : > { %s229_s5 = sshll.u32 %s217_s4, 4  ;;  %s227_s6 = sshll.u32 %s225_s22, 4  ;;  %s230_s5 = int_to_ptr.vmem [resolvable:$true] %s229_s5  ;;  %s228_s6 = int_to_ptr.hbm [resolvable:$true] %s227_s6 }
  0x20   : > { %s214_s7 = scalar_lea.sflag [#allocation8], %s187_s28  ;;  %238 = sbr.rel (%p235_p3) target bundleno = 289 (0x121), region = 28 }
  0x21   : > { %607 = dma.hbm_to_vmem [thread:$0]  (!%p952_p0), %s228_s6, 32, %s230_s5, %s214_s7  }
  0x22   : > { %s967_s8 = sand.u32 (!%p235_p3), 1, %s840_s13  }
  0x23   : > { %s970_s9 = sshll.u32 (!%p235_p3), %s967_s8, 3  ;;  %s241_s11 = scalar_lea.sflag (!%p235_p3), [#allocation5], %s967_s8 }
  0x24   : > { %s244_s18 = scalar_lea.vmem (!%p235_p3), [#allocation4], %s970_s9 }
  0x25   : > { %819 = dma.done.wait (%p928_p8), %s241_s11, 128  }
  0x26   : > { %821 = vsyncadd (%p928_p8), %s241_s11, 4294967168  ;;  %s575_s28 = sshll.u32 %s967_s8, 1  ;;  %s251_s10 = scalar_lea.sflag [#allocation8], %s967_s8 }
  0x27   : > { %s254_s19 = scalar_lea.vmem [#allocation7], %s575_s28 }
  0x28   : > { %823 = dma.done.wait (%p928_p8), %s251_s10, 32  }
  0x29   : > { %825 = vsyncadd (%p928_p8), %s251_s10, 4294967264  ;;  %v860_v0 = vmov 0.0   ;;  %v301_v1 = vld [vmem:[%s244_s18] sm:$0x3]  ;;  %v578_v2 = vld [vmem:[%s244_s18 + $0x2] sm:$0x3] }
  0x2a   : > { %298 = vst [vmem:[#allocation2] sm:$0x3] %v860_v0  ;;  %v304_v3 = vmax.f32 %v301_v1, %v578_v2  ;;  %v579_v4 = vld [vmem:[%s244_s18 + $0x4] sm:$0x3]  ;;  %v580_v5 = vld [vmem:[%s244_s18 + $0x6] sm:$0x3] }
  0x2b   : > { %299 = vst [vmem:[#allocation3] sm:$0x3] %v860_v0  ;;  %v300_v16 = vld [vmem:[%s254_s19] sm:$0x3]  ;;  %vm359_vm6 = vcmask 1041408   ;;  %s584_s24 = sshll.u32 %s848_s15, 3 }
  0x2c   : > { %v307_v6 = vmax.f32 %v304_v3, %v579_v4  ;;  %vm315_vm0 = vcmp.eq.s32.totalorder %v300_v16, 0  ;;  %vm322_vm1 = vcmp.eq.s32.totalorder %v300_v16, 1  ;;  %vm329_vm2 = vcmp.eq.s32.totalorder %v300_v16, 2  ;;  %s402_s29 = scalar_lea.hbm %s1040_s2, %s584_s24  ;;  %s280_s30 = scalar_lea.vmem [#allocation9], %s970_s9 }
  0x2d   : > { %v316_v22 = vsel %vm315_vm0, %v301_v1, 0.0  ;;  %v323_v23 = vsel %vm322_vm1, %v578_v2, 0.0  ;;  %v330_v27 = vsel %vm329_vm2, %v579_v4, 0.0  ;;  %vm336_vm3 = vcmp.eq.s32.totalorder %v300_v16, 3  ;;  %s404_s22 = sshll.u32 %s280_s30, 4  ;;  %s406_s4 = sshll.u32 %s402_s29, 4  ;;  %s405_s22 = int_to_ptr.vmem [resolvable:$true] %s404_s22  ;;  %s407_s4 = int_to_ptr.hbm [resolvable:$true] %s406_s4 }
  0x2e   : > { %v310_v7 = vmax.f32 %v307_v6, %v580_v5  ;;  %v324_v26 = vadd.f32 %v323_v23, %v316_v22  ;;  %v337_v29 = vsel %vm336_vm3, %v580_v5, 0.0  ;;  %vm343_vm4 = vcmp.ne.s32.totalorder %v300_v16, 4294967196  ;;  %s417_s11 = scalar_lea.hbm %s1041_s3, %s584_s24  ;;  %s386_s18 = scalar_lea.sflag [#allocation6], %s967_s8 }
  0x2f   : > { %s752_s28 = sshra.s32 %s407_s4, 4  ;;  %s758_s21 = scalar_lea.hbm %s1040_s2, 16  ;;  %s753_s28 = int_to_ptr.hbm [resolvable:$true] %s752_s28 }
  0x30   : > { %v311_v8 = vsub.f32 %v301_v1, %v310_v7  ;;  %v318_v9 = vsub.f32 %v578_v2, %v310_v7  ;;  %v325_v10 = vsub.f32 %v579_v4, %v310_v7  ;;  %v332_v11 = vsub.f32 %v580_v5, %v310_v7  ;;  %s754_s15 = scalar_lea.hbm %s753_s28, 8  ;;  %p759_p7 = scmp.lt.s32.totalorder %s753_s28, %s1040_s2 }
  0x31   : > { %v331_v28 = vadd.f32 %v330_v27, %v324_v26  ;;  %v346_v36 = vld [vmem:[#allocation2] sm:$0x3]  ;;  %p755_p4 = scmp.ne.s32.totalorder %s753_s28, %s754_s15  ;;  %p760_p8 = scmp.lt.s32.totalorder %s758_s21, %s754_s15 }
  0x32   : > { %v312_v12 = vmul.f32 1.442695, %v311_v8  ;;  %v319_v13 = vmul.f32 1.442695, %v318_v9  ;;  %v326_v14 = vmul.f32 1.442695, %v325_v10 }
  0x33   : > { %v333_v15 = vmul.f32 1.442695, %v332_v11  ;;  %v338_v31 = vadd.f32 %v337_v29, %v331_v28  ;;  %v350_v37 = vld [vmem:[#allocation3] sm:$0x3]  ;;  %p756_p5 = pnand %p755_p4, %p932_p9  ;;  %p761_p10 = por %p760_p8, %p759_p7 }
  0x34   : > { %668 = vpow2.f32 %v312_v12 }
  0x35   : > { %670 = vpow2.f32 %v319_v13  ;;  %p757_p6 = pneg %p756_p5 }
  0x36   : > { %672 = vpow2.f32 %v326_v14 }
  0x37   : > { %674 = vpow2.f32 %v333_v15  ;;  %p762_p13 = pnand %p761_p10, %p757_p6 }
  0x3a   : > { %v669_v17 = vpop.eup %668 }
  0x3b   : > { %v671_v18 = vpop.eup %670 }
  0x3c   : > { %v673_v19 = vpop.eup %672  ;;  %v321_v20 = vadd.f32 %v671_v18, %v669_v17 }
  0x3d   : > { %v675_v21 = vpop.eup %674 }
  0x3e   : > { %v328_v24 = vadd.f32 %v673_v19, %v321_v20 }
  0x40   : > { %v335_v25 = vadd.f32 %v675_v21, %v328_v24 }
  0x42   : > { %676 = vlog2.f32 %v335_v25 }
  0x48   : > { %v677_v30 = vpop.eup %676 }
  0x49   : > { %v340_v32 = vmul.f32 0.6931472, %v677_v30 }
  0x4b   : > { %v341_v33 = vadd.f32 %v340_v32, %v310_v7 }
  0x4d   : > { %v342_v34 = vsub.f32 %v341_v33, %v338_v31 }
  0x4f   : > { %v344_v35 = vsel %vm343_vm4, %v342_v34, 0.0 }
  0x50   : > { %vm345_vm5 = vcmp.ge.f32.partialorder %v344_v35, 0.4 }
  0x51   : > { %v347_v38 = vsel %vm345_vm5, %v344_v35, 0.0  ;;  %v581_v39 = vsel %vm345_vm5, 1.0, %v860_v0 }
  0x52   : > { %v348_v40 = vadd.f32 %v347_v38, %v346_v36  ;;  %v353_v41 = vadd.f32 %v581_v39, %v350_v37 }
  0x54   : > { %349 = vst [vmem:[#allocation2] sm:$0x3] %v348_v40 }
  0x55   : > { %354 = vst [vmem:[#allocation3] sm:$0x3] %v353_v41 }
  0x5b   : > { %v358_v42 = vld [vmem:[#allocation2] sm:$0x3] }
  0x5c   : > { %v360_v43 = vsel %vm359_vm6, %v358_v42, 0.0  ;;  %v370_v44 = vld [vmem:[#allocation3] sm:$0x3] }
  0x5d   : > { %361 = vadd.xlane.f32.xlu0 %v360_v43  ;;  %v371_v45 = vsel %vm359_vm6, %v370_v44, 0.0 }
  0x65   : > { %372 = vadd.xlane.f32.xlu0 %v371_v45 }
  0xd0   : > { %v362_v46 = vpop.xlane.xlu0 %361 }
  0xd1   : > { %v363_v47 = vrot.slane %v362_v46, 4 }
  0xd3   : > { %v364_v48 = vadd.f32 %v363_v47, %v362_v46 }
  0xd5   : > { %v365_v49 = vrot.slane %v364_v48, 2 }
  0xd7   : > { %v366_v50 = vadd.f32 %v365_v49, %v364_v48 }
  0xd8   : > { %v373_v51 = vpop.xlane.xlu0 %372 }
  0xd9   : > { %v374_v52 = vrot.slane %v373_v51, 4  ;;  %v367_v53 = vrot.slane %v366_v50, 1 }
  0xdb   : > { %v375_v54 = vadd.f32 %v374_v52, %v373_v51  ;;  %v368_v55 = vadd.f32 %v367_v53, %v366_v50 }
  0xdd   : > { %v376_v56 = vrot.slane %v375_v54, 2  ;;  %589 = vpush %v368_v55 }
  0xdf   : > { %v377_v57 = vadd.f32 %v376_v56, %v375_v54 }
  0xe1   : > { %v378_v58 = vrot.slane %v377_v57, 1 }
  0xe3   : > { %v379_v59 = vadd.f32 %v378_v58, %v377_v57 }
  0xe5   : > { %591 = vpush %v379_v59 }
 0x10e   : > { %s590_s5 = spop %589 }
 0x10f   : > { %v381_v60 = vstv %s590_s5 }
 0x110   : > { %382 = vst [vmem:[%s280_s30] sm:$0xff] %v381_v60 }
 0x111   : > { %765 = shalt.err (!%p762_p13)
}
 0x112   : > { %597 = dma.vmem_to_hbm [thread:$0]  (%p932_p9), %s405_s22, 128, %s407_s4, %s386_s18  }
 0x113   : > { %s287_s24 = scalar_lea.vmem [#allocation10], %s970_s9  ;;  %s421_s5 = sshll.u32 %s417_s11, 4  ;;  %s422_s5 = int_to_ptr.hbm [resolvable:$true] %s421_s5 }
 0x114   : > { %s419_s30 = sshll.u32 %s287_s24, 4  ;;  %s391_s7 = scalar_lea.sflag [#allocation11], %s967_s8  ;;  %s420_s30 = int_to_ptr.vmem [resolvable:$true] %s419_s30 }
 0x115   : > { %s780_s28 = sshra.s32 %s422_s5, 4  ;;  %s786_s22 = scalar_lea.hbm %s1041_s3, 16  ;;  %s781_s28 = int_to_ptr.hbm [resolvable:$true] %s780_s28 }
 0x116   : > { %s592_s6 = spop %591  ;;  %s782_s15 = scalar_lea.hbm %s781_s28, 8 }
 0x117   : > { %v383_v61 = vstv %s592_s6  ;;  %p783_p0 = scmp.ne.s32.totalorder %s781_s28, %s782_s15  ;;  %p787_p3 = scmp.lt.s32.totalorder %s781_s28, %s1041_s3 }
 0x118   : > { %384 = vst [vmem:[%s287_s24] sm:$0xff] %v383_v61  ;;  %p788_p4 = scmp.lt.s32.totalorder %s786_s22, %s782_s15 }
 0x119   : > { %p784_p1 = pnand %p783_p0, %p932_p9 }
 0x11a   : > { %p789_p5 = por %p788_p4, %p787_p3 }
 0x11b   : > { %p785_p2 = pneg %p784_p1 }
 0x11d   : > { %p790_p6 = pnand %p789_p5, %p785_p2 }
 0x11f   : > { %793 = shalt.err (!%p790_p6)
}
 0x120   : > { %598 = dma.vmem_to_hbm [thread:$0]  (%p932_p9), %s420_s30, 128, %s422_s5, %s391_s7  }
 0x121 PF: > { %s433_s8 = sand.u32 1, %s836_s12   ;;  %p609_p7 = pnand %p567_p12, %p939_p11 }
 0x122   : > { %s434_s11 = scalar_lea.sflag [#allocation6], %s433_s8 }
 0x123   : > { %p610_p8 = pneg %p609_p7 }
 0x125   : > { %827 = dma.done.wait (%p610_p8), %s434_s11, 128  }
 0x126   : > { %829 = vsyncadd (%p610_p8), %s434_s11, 4294967168  ;;  %s444_s18 = scalar_lea.sflag [#allocation11], %s433_s8 }
 0x127   : > { %831 = dma.done.wait (%p610_p8), %s444_s18, 128  }
 0x128   : > { %833 = vsyncadd (%p610_p8), %s444_s18, 4294967168  ;;  %s26_s17 = sadd.s32 1, %s856_s17   ;;  %s1047_s12 = smov %s840_s13 }
 0x129   : > { %p23_p10 = scmp.ge.s32.totalorder %s26_s17, 4   ;;  %s1048_s13 = smov %s844_s14 }
 0x12a   : > { %s1049_s14 = smov %s937_s26  ;;  %s1050_s15 = smov %s852_s16 }
 0x12b   : > { %s1051_s16 = smov %s1053_s20  ;;  %25 = sbr.rel (!%p23_p10) target bundleno = 10 (0xa), region = 114 }
 0x130   :  { %450 = vsyncpa [#allocation5], 1 }
 0x131   :  { %452 = vsyncpa [#allocation5 + $0x1], 1 }
 0x132   :  { %453 = vsyncpa [#allocation8], 1 }
 0x133   :  { %455 = vsyncpa [#allocation8 + $0x1], 1 }
 0x134   :  { %456 = vsyncpa [#allocation6], 1 }
 0x135   :  { %458 = vsyncpa [#allocation6 + $0x1], 1 }
 0x136   :  { %459 = vsyncpa [#allocation11], 1 }
 0x137   :  { %461 = vsyncpa [#allocation11 + $0x1], 1 }

</bundles_post_ra>
